<compile_context>
chip_gen: v6e
topology: v6e:2x2x1
jax: 0.10.0
libtpu: 0.0.40
codegen_flags: <defaults>
</compile_context>

<pallas_src>
import functools
import math

import jax
import jax.numpy as jnp
from jax.experimental import pallas as pl
from jax.experimental.pallas import tpu as pltpu


# Budget for keeping the embedding table resident in VMEM: 16 MiB leaves ample
# headroom on v7x (64 MiB physical VMEM) as well as v5e/v6e (128 MiB).
_RESIDENT_TABLE_MAX_BYTES = 16 * 1024 * 1024
_ONE_HOT_MAX_VOCAB = 2048
_N_INFLIGHT_DMAS = 8                 # outstanding row gathers in the HBM path
_MAX_TILE_BYTES = 4 * 1024 * 1024    # cap on one (TM, d_model) f32 tile


def _round_up(x, m):
    return (x + m - 1) // m * m


def _onehot_embed_kernel(ids_ref, table_ref, out_ref, *, scale):
    """Resident-table path: gather TM rows via a one-hot MXU matmul."""
    tm = out_ref.shape[0]
    vocab = table_ref.shape[0]
    ids = ids_ref[...]                                    # (TM, 1) int32
    cols = jax.lax.broadcasted_iota(jnp.int32, (tm, vocab), 1)
    onehot = (ids == cols).astype(table_ref.dtype)        # (TM, vocab)
    rows = jnp.dot(onehot, table_ref[...],
                   preferred_element_type=jnp.float32)    # (TM, d_model) f32
    out_ref[...] = (rows * scale).astype(out_ref.dtype)


def _dma_gather_kernel(ids_ref, table_hbm, out_ref, rows_vmem, copy_sems, *,
                       scale, n_inflight):
    """HBM-table path: TM per-row DMA gathers with a rolling in-flight window."""
    tm = out_ref.shape[0]

    def row_copy(r):
        tok = ids_ref[0, r]                               # scalar read from SMEM
        return pltpu.make_async_copy(table_hbm.at[tok], rows_vmem.at[r],
                                     copy_sems.at[r % n_inflight])

    # Prime the pipeline with up to n_inflight outstanding row gathers.
    @pl.loop(0, min(n_inflight, tm))
    def _(r):
        row_copy(r).start()

    # For each row: wait for it, then immediately refill the window.
    @pl.loop(0, tm)
    def _(r):
        row_copy(r).wait()

        @pl.when(r + n_inflight < tm)
        def _():
            row_copy(r + n_inflight).start()

    # One dense (TM, d_model) scaled store; scale applied in f32.
    out_ref[...] = (rows_vmem[...].astype(jnp.float32) * scale).astype(out_ref.dtype)


def input_embedding(token_ids, emb_table, *, block_tokens=256):
    """token_ids: (B, S) int; emb_table: (vocab, d_model).
    Returns (B, S, d_model) = emb_table[token_ids] * sqrt(d_model)."""
    B, S = token_ids.shape
    vocab, d_model = emb_table.shape
    n_tok = B * S
    scale = float(math.sqrt(d_model))
    dtype = emb_table.dtype
    itemsize = jnp.dtype(dtype).itemsize
    table_bytes = vocab * d_model * itemsize

    # Clamp ids so an out-of-range token can never gather outside the table.
    ids = jnp.clip(token_ids.reshape(n_tok).astype(jnp.int32), 0, vocab - 1)

    # Token-tile size: multiple of 8 (f32 sublane), capped so one tile stays
    # well inside VMEM even for large d_model.
    tm = min(_round_up(block_tokens, 8), _round_up(n_tok, 8))
    tm_cap = max(8, (_MAX_TILE_BYTES // max(1, d_model * 4)) // 8 * 8)
    tm = max(8, min(tm, tm_cap))
    n_pad = _round_up(n_tok, tm)
    if n_pad != n_tok:
        ids = jnp.pad(ids, (0, n_pad - n_tok))            # pad with token 0 (valid row)
    n_tiles = n_pad // tm

    tile_bytes = tm * d_model * itemsize
    cost = pl.CostEstimate(
        flops=2 * n_tok * d_model,
        transcendentals=0,
        bytes_accessed=int(table_bytes + n_tok * 4 + 2 * n_tok * d_model * itemsize),
    )

    use_resident = (vocab <= _ONE_HOT_MAX_VOCAB
                    and table_bytes <= _RESIDENT_TABLE_MAX_BYTES)

    if use_resident:
        # v7x-safe VMEM budget: resident table (x2 for buffering headroom) plus
        # a few output tiles; never ask for more than 56 MiB.
        vmem_limit = max(32 * 1024 * 1024,
                         min(56 * 1024 * 1024,
                             2 * table_bytes + 6 * tile_bytes + (2 << 20)))
        grid_spec = pltpu.PrefetchScalarGridSpec(
            num_scalar_prefetch=0,
            grid=(n_tiles,),
            in_specs=[
                # (TM, 1) column of token ids per tile (VMEM).
                pl.BlockSpec((tm, 1), lambda i: (i, 0)),
                # Full table, resident across the grid (constant index_map).
                pl.BlockSpec((vocab, d_model), lambda i: (0, 0)),
            ],
            out_specs=pl.BlockSpec((tm, d_model), lambda i: (i, 0)),
        )
        out_flat = pl.pallas_call(
            functools.partial(_onehot_embed_kernel, scale=scale),
            out_shape=jax.ShapeDtypeStruct((n_pad, d_model), dtype),
            grid_spec=grid_spec,
            compiler_params=pltpu.CompilerParams(
                dimension_semantics=("parallel",),
                vmem_limit_bytes=int(vmem_limit),
            ),
            cost_estimate=cost,
        )(ids.reshape(n_pad, 1), emb_table)
    else:
        n_inflight = min(_N_INFLIGHT_DMAS, tm)
        vmem_limit = max(32 * 1024 * 1024,
                         min(56 * 1024 * 1024, 5 * tile_bytes + (2 << 20)))
        grid_spec = pltpu.PrefetchScalarGridSpec(
            num_scalar_prefetch=0,
            grid=(n_tiles,),
            in_specs=[
                # Per-tile chunk of ids lands in SMEM (scalar reads drive DMAs);
                # avoids one giant scalar-prefetch array at large B*S.
                pl.BlockSpec((1, tm), lambda i: (i, 0),
                             memory_space=pltpu.MemorySpace.SMEM),
                # Table stays in HBM; rows are gathered manually.
                pl.BlockSpec(memory_space=pl.ANY),
            ],
            out_specs=pl.BlockSpec((tm, d_model), lambda i: (i, 0)),
            scratch_shapes=[
                pltpu.VMEM((tm, d_model), dtype),
                pltpu.SemaphoreType.DMA((n_inflight,)),
            ],
        )
        out_flat = pl.pallas_call(
            functools.partial(_dma_gather_kernel, scale=scale,
                              n_inflight=n_inflight),
            out_shape=jax.ShapeDtypeStruct((n_pad, d_model), dtype),
            grid_spec=grid_spec,
            compiler_params=pltpu.CompilerParams(
                dimension_semantics=("parallel",),
                vmem_limit_bytes=int(vmem_limit),
            ),
            cost_estimate=cost,
        )(ids.reshape(n_tiles, tm), emb_table)

    return out_flat[:n_tok].reshape(B, S, d_model)


if __name__ == "__main__":
    # Small, deterministic setup consistent with the module:
    # d_model=128 (lane-dense), vocab_size=64, batch=2, seq=8.
    d_model = 128
    vocab_size = 64
    B, S = 2, 8

    key = jax.random.PRNGKey(0)
    k_emb, k_ids = jax.random.split(key)

    # nn.Embedding default init: N(0, 1)
    emb_table = jax.random.normal(k_emb, (vocab_size, d_model), dtype=jnp.float32)
    token_ids = jax.random.randint(k_ids, (B, S), 0, vocab_size, dtype=jnp.int32)

    out = input_embedding(token_ids, emb_table)
    out = jax.block_until_ready(out)

    # Reference check against plain JAX gather.
    ref = emb_table[token_ids] * math.sqrt(d_model)
    assert out.shape == (B, S, d_model)
    assert jnp.allclose(out, ref, atol=1e-5, rtol=1e-5)

    print("KERNEL_OK")
</pallas_src>

<mosaic_0001>
module attributes {stable_mosaic.version = 11 : i64} {
  func.func @_onehot_embed_kernel(%arg0: i32, %arg1: memref<16x1xi32, #tpu.memory_space<vmem>>, %arg2: memref<64x128xf32, #tpu.memory_space<vmem>>, %arg3: memref<16x128xf32, #tpu.memory_space<vmem>>) attributes {dimension_semantics = [#tpu.dimension_semantics<parallel>], iteration_bounds = array<i64: 1>, scalar_prefetch = 0 : i64, scratch_operands = 0 : i64, tpu.core_type = #tpu.core_type<tc>, window_params = [{transform_indices = @transform_0, window_bounds = array<i64: 16, 1>}, {pipeline_mode = #tpu.pipeline_mode<synchronous>, transform_indices = @transform_1, window_bounds = array<i64: 64, 128>}, {transform_indices = @transform_2, window_bounds = array<i64: 16, 128>}]} {
    %c0 = arith.constant 0 : index
    %c0_0 = arith.constant 0 : index
    %0 = vector.load %arg1[%c0, %c0_0] : memref<16x1xi32, #tpu.memory_space<vmem>>, vector<16x1xi32>
    %1 = tpu.iota {dimensions = array<i32: 1>} : vector<16x64xi32>
    %2 = vector.broadcast %0 : vector<16x1xi32> to vector<16x64xi32>
    %3 = arith.cmpi eq, %2, %1 : vector<16x64xi32>
    %4 = arith.extui %3 : vector<16x64xi1> to vector<16x64xi32>
    %5 = arith.sitofp %4 : vector<16x64xi32> to vector<16x64xf32>
    %c0_1 = arith.constant 0 : index
    %c0_2 = arith.constant 0 : index
    %6 = vector.load %arg2[%c0_1, %c0_2] : memref<64x128xf32, #tpu.memory_space<vmem>>, vector<64x128xf32>
    %cst = arith.constant dense<0.000000e+00> : vector<16x128xf32>
    %7 = tpu.matmul %5, %6, %cst {dimension_numbers = #tpu.dot_dimension_numbers<[1], [0], [0], [1], [0, 0, 1, 1], [], []>} : vector<16x64xf32>, vector<64x128xf32>, vector<16x128xf32> -> vector<16x128xf32>
    %cst_3 = arith.constant 11.3137083 : f32
    %8 = vector.broadcast %cst_3 : f32 to vector<16x128xf32>
    %9 = arith.mulf %7, %8 : vector<16x128xf32>
    %c0_4 = arith.constant 0 : index
    %c0_5 = arith.constant 0 : index
    %10 = vector.load %arg3[%c0_4, %c0_5] : memref<16x128xf32, #tpu.memory_space<vmem>>, vector<16x128xf32>
    tpu.vector_store %arg3[%c0_4, %c0_5], %9 {strides = array<i32>} : memref<16x128xf32, #tpu.memory_space<vmem>>, vector<16x128xf32>,
    return
  }
  func.func @transform_0(%arg0: i32) -> (i32, i32) {
    %c0_i32 = arith.constant 0 : i32
    %c0_i32_0 = arith.constant 0 : i32
    return %arg0, %c0_i32 : i32, i32
  }
  func.func @transform_1(%arg0: i32) -> (i32, i32) {
    %c0_i32 = arith.constant 0 : i32
    %c0_i32_0 = arith.constant 0 : i32
    %c0_i32_1 = arith.constant 0 : i32
    return %c0_i32, %c0_i32_0 : i32, i32
  }
  func.func @transform_2(%arg0: i32) -> (i32, i32) {
    %c0_i32 = arith.constant 0 : i32
    %c0_i32_0 = arith.constant 0 : i32
    return %arg0, %c0_i32 : i32, i32
  }
}

</mosaic_0001>

<bundles_post_ra>
// kernel: tpu_custom_call.1
= control target key start
LH: loop header
LB: loop body
LE: loop exit
PB: predicated region body
PF: predicated region fallthrough
CT: control target
= control target key end

     0   :  { %7 = vsyncpa [#allocation3], 0  ;;  %s276_s0 = inlined_call_operand.vmem [shape: s32[16,1], index: 0, kind: input, shape index: {}]   ;;  %s277_s1 = inlined_call_operand.hbm [shape: f32[64,128], index: 1, kind: input, shape index: {}]   ;;  %s278_s2 = inlined_call_operand.hbm [shape: f32[16,128], index: 2, kind: output, shape index: {}]  }
   0x1   :  { %8 = vsyncpa [#allocation4], 0  ;;  %s237_s9 = smov [#allocation2]  }
   0x2   :  { %s16_s10 = sshll.u32 %s237_s9, 4  ;;  %s17_s10 = int_to_ptr.vmem [resolvable:$true] %s16_s10 }
   0x3   :  { %s201_s11 = scalar_lea.vmem %s17_s10, 1024  ;;  %p206_p1 = scmp.lt.s32.totalorder %s17_s10, %s17_s10 }
   0x4   :  { %p202_p0 = scmp.ne.s32.totalorder %s17_s10, %s201_s11  ;;  %p207_p2 = scmp.lt.s32.totalorder %s201_s11, %s201_s11 }
   0x6   :  { %p208_p3 = por %p207_p2, %p206_p1 }
   0x8   :  { %p209_p4 = pnand %p208_p3, %p202_p0 }
   0xa   :  { %212 = shalt.err (!%p209_p4)
}
   0xb   :  { %s238_s12 = smov 128   ;;  %s239_s13 = smov 8  }
   0xc   :  { %22 = dma.hbm_to_vmem [thread:$0]  %s277_s1, 1024, %s17_s10, [#allocation3], %s238_s12, %s238_s12, %s239_s13  }
   0xd   :  { %233 = dma.done.wait [#allocation3], 1024  }
   0xe   :  { %234 = vsyncadd [#allocation3], 4294966272  ;;  %v240_v0 = vmov 0   ;;  %v26_v1 = vld [vmem:[%s276_s0] sm:$0xff]  ;;  %v49_v2 = vld [vmem:[#allocation2 + $0x38] sm:$0xff]  ;;  %v28_v11 = vlaneseq  ;;  %vm50_vm0 = vcmask 523264  }
   0xf   :  { %192 = vset.pattern.permute.xlu0 %v240_v0  ;;  %167 = vmatprep.subr.mxu0 %v49_v2  ;;  %v48_v3 = vld [vmem:[#allocation2 + $0x30] sm:$0xff]  ;;  %v27_v4 = vld [vmem:[%s276_s0 + $0x8] sm:$0xff]  ;;  %v46_v6 = vld [vmem:[#allocation2 + $0x20] sm:$0xff]  ;;  %v241_v14 = vmov 0.0   ;;  %s242_s0 = smov [#allocation5]  }
  0x10   :  { %31 = vperm.xlu0 %192, %v26_v1   ;;  %168 = vmatpush3.msra.mxu0 %v49_v2  ;;  %v47_v5 = vld [vmem:[#allocation2 + $0x28] sm:$0xff]  ;;  %v45_v7 = vld [vmem:[#allocation2 + $0x18] sm:$0xff]  ;;  %v44_v8 = vld [vmem:[#allocation2 + $0x10] sm:$0xff]  ;;  %v29_v12 = vand.u32 127, %v28_v11  ;;  %s141_s1 = sshll.u32 %s242_s0, 4  ;;  %s142_s1 = int_to_ptr.vmem [resolvable:$true] %s141_s1 }
  0x11   :  { %169 = vmatprep.subr.mxu0 %v48_v3  ;;  %v43_v9 = vld [vmem:[#allocation2 + $0x8] sm:$0xff]  ;;  %v42_v10 = vld [vmem:[#allocation2] sm:$0xff]  ;;  %s213_s20 = scalar_lea.vmem %s142_s1, 256  ;;  %p218_p6 = scmp.lt.s32.totalorder %s142_s1, %s142_s1 }
  0x12   :  { %170 = vmatpush3.msra.mxu0 %v48_v3  ;;  %p214_p5 = scmp.ne.s32.totalorder %s142_s1, %s213_s20  ;;  %p219_p7 = scmp.lt.s32.totalorder %s213_s20, %s213_s20 }
  0x13   :  { %171 = vmatprep.subr.mxu0 %v47_v5 }
  0x14   :  { %34 = vperm.xlu0 %192, %v27_v4   ;;  %172 = vmatpush3.msra.mxu0 %v47_v5  ;;  %p220_p8 = por %p219_p7, %p218_p6 }
  0x15   :  { %173 = vmatprep.subr.mxu0 %v46_v6 }
  0x16   :  { %174 = vmatpush3.msra.mxu0 %v46_v6  ;;  %p221_p9 = pnand %p220_p8, %p214_p5 }
  0x17   :  { %175 = vmatprep.subr.mxu0 %v45_v7 }
  0x18   :  { %176 = vmatpush3.msra.mxu0 %v45_v7 }
  0x19   :  { %177 = vmatprep.subr.mxu0 %v44_v8 }
  0x1a   :  { %178 = vmatpush3.msra.mxu0 %v44_v8 }
  0x1b   :  { %179 = vmatprep.subr.mxu0 %v43_v9 }
  0x1c   :  { %180 = vmatpush3.msra.mxu0 %v43_v9 }
  0x1d   :  { %181 = vmatprep.subr.mxu0 %v42_v10 }
  0x1e   :  { %182 = vmatpush3.msra.mxu0 %v42_v10 }
  0x8b   :  { %v32_v13 = vpop.permute.xlu0 %31 }
  0x8c   :  { %vm36_vm1 = vcmp.eq.s32.totalorder %v32_v13, %v29_v12 }
  0x8d   :  { %v153_v15 = vsel %vm36_vm1, 1.0, %v241_v14 }
  0x8e   :  { %183 = vmatprep.mubr.msk.f32.mxu0 %vm50_vm0, %v153_v15 }
  0x8f   :  { %v35_v16 = vpop.permute.xlu0 %34 }
  0x90   :  { %vm37_vm2 = vcmp.eq.s32.totalorder %v35_v16, %v29_v12 }
  0x91   :  { %v154_v17 = vsel %vm37_vm2, 1.0, %v241_v14 }
  0x92   :  { %184 = vmatmul.mubr.msk.f32.vlgmr.msra.gmra.mxu0 %vm50_vm0, %v154_v17 }
 0x152   :  { %v185_v18 = vpop.f32.mrf.mxu0 }
 0x153   :  { %v133_v19 = vmul.f32 11.313708, %v185_v18 }
 0x154   :  { %v123_v20 = vpop.f32.mrf.mxu0 }
 0x155   :  { %135 = vst [vmem:[#allocation5 + $0x8] sm:$0xff] %v133_v19  ;;  %v132_v21 = vmul.f32 11.313708, %v123_v20 }
 0x157   :  { %134 = vst [vmem:[#allocation5] sm:$0xff] %v132_v21 }
 0x158   :  { %224 = shalt.err (!%p221_p9)
}
 0x159   :  { %147 = dma.vmem_to_hbm [thread:$0]  %s142_s1, 256, %s278_s2, [#allocation4], %s238_s12, %s238_s12, %s239_s13  }
 0x15a   :  { %235 = dma.done.wait [#allocation4], 256  }
 0x15b   :  { %236 = vsyncadd [#allocation4], 4294967040 }
 0x15c   :  { %151 = vsyncpa [#allocation3], 1 }
 0x15d   :  { %152 = vsyncpa [#allocation4], 1 }

</bundles_post_ra>
